<compile_context>
chip_gen: v7x
topology: tpu7x:2x2x1
jax: 0.10.0
libtpu: 0.0.40
codegen_flags: <defaults>
</compile_context>

<pallas_src>
import math

import jax
import jax.numpy as jnp
from jax import lax
from jax.experimental import pallas as pl
from jax.experimental.pallas import tpu as pltpu

N = 10                    # plate_1 size
K = 5                     # number of categories == event size of obs
NK = N * K                # 50 flattened obs elements per trace

LANES = 128               # one trace per 128-lane row
BLOCK = 32                # traces per grid step (multiple of 8)

MU_OFF = NK               # lanes 50..54: mu logits / gumbel
SG_OFF = NK + K           # lanes 55..59: sigma logits / gumbel
MU_LANE = NK              # output lane 50: mu
SG_LANE = NK + 1          # output lane 51: sigma
LP_LANE = NK + 2          # output lane 52: joint log-prob

HALF_LOG_2PI = 0.5 * math.log(2.0 * math.pi)


def p_kernel(params_ref, noise_ref, out_ref):
    params = params_ref[...]                   # (8, 128) resident constants
    noise = noise_ref[...]                     # (TB, 128) per-trace noise rows
    tb = noise.shape[0]

    logits_row = params[0:1, :]                # raw logits in lanes 50..59
    logsm_row = params[1:2, :]                 # log-softmax in lanes 50..59

    col = lax.broadcasted_iota(jnp.int32, (tb, LANES), 1)
    obs_mask = col < NK
    mu_mask = (col >= MU_OFF) & (col < MU_OFF + K)
    sg_mask = (col >= SG_OFF) & (col < SG_OFF + K)

    neg_inf = jnp.float32(-jnp.inf)
    big = jnp.int32(2 ** 30)

    # ---- tr['mu'], tr['sigma']: Categorical via Gumbel-max ------------------
    z = noise + logits_row                     # gumbel + logits on lanes 50..59
    zmax_mu = jnp.max(jnp.where(mu_mask, z, neg_inf), axis=-1, keepdims=True)
    zmax_sg = jnp.max(jnp.where(sg_mask, z, neg_inf), axis=-1, keepdims=True)
    idx_mu = jnp.min(jnp.where(mu_mask & (z >= zmax_mu), col - MU_OFF, big),
                     axis=-1, keepdims=True)   # (TB, 1) int in [0, K)
    idx_sg = jnp.min(jnp.where(sg_mask & (z >= zmax_sg), col - SG_OFF, big),
                     axis=-1, keepdims=True)

    mu_f = idx_mu.astype(jnp.float32)          # (TB, 1)
    sg_f = idx_sg.astype(jnp.float32)          # (TB, 1)

    # Categorical log-probs: pick the sampled entries of the precomputed
    # log-softmax rows (mu + sigma fused into a single lane reduction).
    pick = (mu_mask & ((col - MU_OFF) == idx_mu)) | \
           (sg_mask & ((col - SG_OFF) == idx_sg))
    lp_cat = jnp.sum(jnp.where(pick, logsm_row, 0.0), axis=-1, keepdims=True)

    # ---- tr['obs']: Normal(mu, exp(sigma)) over plate N, event K ------------
    eps = jnp.where(obs_mask, noise, 0.0)      # N(0,1) on lanes 0..49, else 0
    scale = jnp.exp(sg_f)                      # (TB, 1)
    obs = jnp.where(obs_mask, mu_f + scale * eps, 0.0)

    # log N(obs; mu, exp(sigma)) = -0.5*eps^2 - sigma - 0.5*log(2*pi), summed.
    lp_obs = (-0.5 * jnp.sum(eps * eps, axis=-1, keepdims=True)
              - jnp.float32(NK) * (sg_f + jnp.float32(HALF_LOG_2PI)))
    logp = lp_cat + lp_obs                     # (TB, 1)

    # ---- pack one lane-dense row per trace: single unmasked store -----------
    canvas = obs
    canvas = jnp.where(col == MU_LANE, mu_f, canvas)
    canvas = jnp.where(col == SG_LANE, sg_f, canvas)
    canvas = jnp.where(col == LP_LANE, logp, canvas)

    out_ref[...] = canvas


def run_p(prob_mu, prob_sigma, key, n_traces, block=BLOCK):
    """Sample `n_traces` independent traces of P and their joint log-probs.

    Returns (n_traces, 128) f32; per trace row: obs (N*K flat, row-major) in
    lanes 0..49, [mu, sigma, logp] in lanes 50..52.
    """
    s_pad = ((n_traces + block - 1) // block) * block

    # Resident constants: logits + hoisted log-softmax, packed lane-dense.
    params = jnp.zeros((8, LANES), jnp.float32)
    params = params.at[0, MU_OFF:MU_OFF + K].set(prob_mu)
    params = params.at[0, SG_OFF:SG_OFF + K].set(prob_sigma)
    params = params.at[1, MU_OFF:MU_OFF + K].set(jax.nn.log_softmax(prob_mu))
    params = params.at[1, SG_OFF:SG_OFF + K].set(jax.nn.log_softmax(prob_sigma))

    # One (S, 128) noise slab: lanes 0..49 N(0,1), 50..54 / 55..59 Gumbel(0,1).
    k_eps, k_gmu, k_gsg = jax.random.split(key, 3)
    eps = jax.random.normal(k_eps, (s_pad, NK), jnp.float32)
    g_mu = jax.random.gumbel(k_gmu, (s_pad, K), jnp.float32)
    g_sg = jax.random.gumbel(k_gsg, (s_pad, K), jnp.float32)
    pad = jnp.zeros((s_pad, LANES - (NK + 2 * K)), jnp.float32)
    noise = jnp.concatenate([eps, g_mu, g_sg, pad], axis=1)

    out = pl.pallas_call(
        p_kernel,
        out_shape=jax.ShapeDtypeStruct((s_pad, LANES), jnp.float32),
        grid=(s_pad // block,),
        in_specs=[pl.BlockSpec((8, LANES), lambda i: (0, 0)),
                  pl.BlockSpec((block, LANES), lambda i: (i, 0))],
        out_specs=pl.BlockSpec((block, LANES), lambda i: (i, 0)),
        compiler_params=pltpu.CompilerParams(
            dimension_semantics=("parallel",)),      # both TCs on v7x
    )(params, noise)
    return out[:n_traces], noise[:n_traces]


if __name__ == "__main__":
    # Module parameters (from __init__), used as logits as in the module.
    prob_mu = jnp.array([0.1, 0.8, 0.05, 0.05, 0.05], dtype=jnp.float32)
    prob_sigma = jnp.array([0.1, 0.8, 0.05, 0.05, 0.05], dtype=jnp.float32)

    S = 64                                          # independent traces
    key = jax.random.PRNGKey(0)

    out, noise = run_p(prob_mu, prob_sigma, key, S)
    out = jax.block_until_ready(out)                # (S, 128)

    # Unpack the lane-packed rows.
    obs = out[:, :NK].reshape(S, N, K)
    mu_f = out[:, MU_LANE]
    sigma_f = out[:, SG_LANE]
    logp = out[:, LP_LANE]

    mu = jnp.round(mu_f).astype(jnp.int32)
    sigma = jnp.round(sigma_f).astype(jnp.int32)

    # Category indices are valid integers in [0, K).
    assert bool(jnp.all((mu >= 0) & (mu < K)))
    assert bool(jnp.all((sigma >= 0) & (sigma < K)))
    assert bool(jnp.all(mu_f == mu.astype(jnp.float32)))
    assert bool(jnp.all(sigma_f == sigma.astype(jnp.float32)))

    # Gumbel-max samples match a pure-JAX recompute from the same noise.
    mu_ref = jnp.argmax(prob_mu[None, :] + noise[:, MU_OFF:MU_OFF + K], axis=1)
    sg_ref = jnp.argmax(prob_sigma[None, :] + noise[:, SG_OFF:SG_OFF + K], axis=1)
    assert bool(jnp.all(mu == mu_ref.astype(jnp.int32)))
    assert bool(jnp.all(sigma == sg_ref.astype(jnp.int32)))

    # Self-consistency: recompute the joint log-prob of the sampled trace in
    # pure JAX from the kernel's own samples and compare to the kernel's logp.
    logsm_mu = jax.nn.log_softmax(prob_mu)
    logsm_sigma = jax.nn.log_softmax(prob_sigma)
    scl = jnp.exp(sigma_f)
    zz = (obs - mu_f[:, None, None]) / scl[:, None, None]
    lp_obs_ref = jnp.sum(-0.5 * zz * zz - sigma_f[:, None, None]
                         - 0.5 * jnp.log(2.0 * jnp.pi), axis=(1, 2))
    lp_ref = logsm_mu[mu] + logsm_sigma[sigma] + lp_obs_ref
    assert jnp.allclose(logp, lp_ref, atol=1e-2, rtol=1e-4), (logp, lp_ref)

    # Padding lanes (53..127) of each packed row are zero.
    pad_lanes = out[:, LP_LANE + 1:]
    assert bool(jnp.all(pad_lanes == 0.0))

    print("KERNEL_OK")
</pallas_src>

<mosaic_0001>
module attributes {stable_mosaic.version = 11 : i64} {
  func.func @p_kernel(%arg0: i32, %arg1: memref<8x128xf32, #tpu.memory_space<vmem>>, %arg2: memref<32x128xf32, #tpu.memory_space<vmem>>, %arg3: memref<32x128xf32, #tpu.memory_space<vmem>>) attributes {dimension_semantics = [#tpu.dimension_semantics<parallel>], iteration_bounds = array<i64: 2>, scalar_prefetch = 0 : i64, scratch_operands = 0 : i64, tpu.core_type = #tpu.core_type<tc>, window_params = [{pipeline_mode = #tpu.pipeline_mode<synchronous>, transform_indices = @transform_0, window_bounds = array<i64: 8, 128>}, {transform_indices = @transform_1, window_bounds = array<i64: 32, 128>}, {transform_indices = @transform_2, window_bounds = array<i64: 32, 128>}]} {
    %c0 = arith.constant 0 : index
    %c0_0 = arith.constant 0 : index
    %0 = vector.load %arg1[%c0, %c0_0] : memref<8x128xf32, #tpu.memory_space<vmem>>, vector<8x128xf32>
    %c0_1 = arith.constant 0 : index
    %c0_2 = arith.constant 0 : index
    %1 = vector.load %arg2[%c0_1, %c0_2] : memref<32x128xf32, #tpu.memory_space<vmem>>, vector<32x128xf32>
    %2 = vector.extract_strided_slice %0 {offsets = [0, 0], sizes = [1, 128], strides = [1, 1]} : vector<8x128xf32> to vector<1x128xf32>
    %3 = vector.extract_strided_slice %0 {offsets = [1, 0], sizes = [1, 128], strides = [1, 1]} : vector<8x128xf32> to vector<1x128xf32>
    %4 = tpu.iota {dimensions = array<i32: 1>} : vector<32x128xi32>
    %c50_i32 = arith.constant 50 : i32
    %5 = vector.broadcast %c50_i32 : i32 to vector<32x128xi32>
    %6 = arith.cmpi slt, %4, %5 : vector<32x128xi32>
    %c50_i32_3 = arith.constant 50 : i32
    %7 = vector.broadcast %c50_i32_3 : i32 to vector<32x128xi32>
    %8 = arith.cmpi sge, %4, %7 : vector<32x128xi32>
    %c55_i32 = arith.constant 55 : i32
    %9 = vector.broadcast %c55_i32 : i32 to vector<32x128xi32>
    %10 = arith.cmpi slt, %4, %9 : vector<32x128xi32>
    %11 = arith.andi %8, %10 : vector<32x128xi1>
    %c55_i32_4 = arith.constant 55 : i32
    %12 = vector.broadcast %c55_i32_4 : i32 to vector<32x128xi32>
    %13 = arith.cmpi sge, %4, %12 : vector<32x128xi32>
    %c60_i32 = arith.constant 60 : i32
    %14 = vector.broadcast %c60_i32 : i32 to vector<32x128xi32>
    %15 = arith.cmpi slt, %4, %14 : vector<32x128xi32>
    %16 = arith.andi %13, %15 : vector<32x128xi1>
    %17 = vector.broadcast %2 : vector<1x128xf32> to vector<32x128xf32>
    %18 = arith.addf %1, %17 : vector<32x128xf32>
    %cst = arith.constant 0xFF800000 : f32
    %19 = vector.broadcast %cst : f32 to vector<32x128xf32>
    %20 = arith.select %11, %18, %19 : vector<32x128xi1>, vector<32x128xf32>
    %cst_5 = arith.constant dense<0xFF800000> : vector<32xf32>
    %21 = vector.multi_reduction <maximumf>, %20, %cst_5 [1] : vector<32x128xf32> to vector<32xf32>
    %22 = vector.shape_cast %21 : vector<32xf32> to vector<32x1xf32>
    %cst_6 = arith.constant 0xFF800000 : f32
    %23 = vector.broadcast %cst_6 : f32 to vector<32x128xf32>
    %24 = arith.select %16, %18, %23 : vector<32x128xi1>, vector<32x128xf32>
    %cst_7 = arith.constant dense<0xFF800000> : vector<32xf32>
    %25 = vector.multi_reduction <maximumf>, %24, %cst_7 [1] : vector<32x128xf32> to vector<32xf32>
    %26 = vector.shape_cast %25 : vector<32xf32> to vector<32x1xf32>
    %27 = vector.broadcast %22 : vector<32x1xf32> to vector<32x128xf32>
    %28 = arith.cmpf oge, %18, %27 : vector<32x128xf32>
    %29 = arith.andi %11, %28 : vector<32x128xi1>
    %c50_i32_8 = arith.constant 50 : i32
    %30 = vector.broadcast %c50_i32_8 : i32 to vector<32x128xi32>
    %31 = arith.subi %4, %30 : vector<32x128xi32>
    %c1073741824_i32 = arith.constant 1073741824 : i32
    %32 = vector.broadcast %c1073741824_i32 : i32 to vector<32x128xi32>
    %33 = arith.select %29, %31, %32 : vector<32x128xi1>, vector<32x128xi32>
    %cst_9 = arith.constant dense<2147483647> : vector<32xi32>
    %34 = vector.multi_reduction <minsi>, %33, %cst_9 [1] : vector<32x128xi32> to vector<32xi32>
    %35 = vector.shape_cast %34 : vector<32xi32> to vector<32x1xi32>
    %36 = vector.broadcast %26 : vector<32x1xf32> to vector<32x128xf32>
    %37 = arith.cmpf oge, %18, %36 : vector<32x128xf32>
    %38 = arith.andi %16, %37 : vector<32x128xi1>
    %c55_i32_10 = arith.constant 55 : i32
    %39 = vector.broadcast %c55_i32_10 : i32 to vector<32x128xi32>
    %40 = arith.subi %4, %39 : vector<32x128xi32>
    %c1073741824_i32_11 = arith.constant 1073741824 : i32
    %41 = vector.broadcast %c1073741824_i32_11 : i32 to vector<32x128xi32>
    %42 = arith.select %38, %40, %41 : vector<32x128xi1>, vector<32x128xi32>
    %cst_12 = arith.constant dense<2147483647> : vector<32xi32>
    %43 = vector.multi_reduction <minsi>, %42, %cst_12 [1] : vector<32x128xi32> to vector<32xi32>
    %44 = vector.shape_cast %43 : vector<32xi32> to vector<32x1xi32>
    %45 = arith.sitofp %35 : vector<32x1xi32> to vector<32x1xf32>
    %46 = arith.sitofp %44 : vector<32x1xi32> to vector<32x1xf32>
    %c50_i32_13 = arith.constant 50 : i32
    %47 = vector.broadcast %c50_i32_13 : i32 to vector<32x128xi32>
    %48 = arith.subi %4, %47 : vector<32x128xi32>
    %49 = vector.broadcast %35 : vector<32x1xi32> to vector<32x128xi32>
    %50 = arith.cmpi eq, %48, %49 : vector<32x128xi32>
    %51 = arith.andi %11, %50 : vector<32x128xi1>
    %c55_i32_14 = arith.constant 55 : i32
    %52 = vector.broadcast %c55_i32_14 : i32 to vector<32x128xi32>
    %53 = arith.subi %4, %52 : vector<32x128xi32>
    %54 = vector.broadcast %44 : vector<32x1xi32> to vector<32x128xi32>
    %55 = arith.cmpi eq, %53, %54 : vector<32x128xi32>
    %56 = arith.andi %16, %55 : vector<32x128xi1>
    %57 = arith.ori %51, %56 : vector<32x128xi1>
    %cst_15 = arith.constant 0.000000e+00 : f32
    %58 = vector.shape_cast %3 : vector<1x128xf32> to vector<1x128xf32>
    %59 = vector.broadcast %58 : vector<1x128xf32> to vector<32x128xf32>
    %60 = vector.broadcast %cst_15 : f32 to vector<32x128xf32>
    %61 = arith.select %57, %59, %60 : vector<32x128xi1>, vector<32x128xf32>
    %cst_16 = arith.constant dense<0.000000e+00> : vector<32xf32>
    %62 = vector.multi_reduction <add>, %61, %cst_16 [1] : vector<32x128xf32> to vector<32xf32>
    %63 = vector.shape_cast %62 : vector<32xf32> to vector<32x1xf32>
    %cst_17 = arith.constant 0.000000e+00 : f32
    %64 = vector.broadcast %cst_17 : f32 to vector<32x128xf32>
    %65 = arith.select %6, %1, %64 : vector<32x128xi1>, vector<32x128xf32>
    %66 = math.exp %46 : vector<32x1xf32>
    %67 = vector.broadcast %66 : vector<32x1xf32> to vector<32x128xf32>
    %68 = arith.mulf %67, %65 : vector<32x128xf32>
    %69 = vector.broadcast %45 : vector<32x1xf32> to vector<32x128xf32>
    %70 = arith.addf %69, %68 : vector<32x128xf32>
    %cst_18 = arith.constant 0.000000e+00 : f32
    %71 = vector.broadcast %cst_18 : f32 to vector<32x128xf32>
    %72 = arith.select %6, %70, %71 : vector<32x128xi1>, vector<32x128xf32>
    %73 = arith.mulf %65, %65 : vector<32x128xf32>
    %cst_19 = arith.constant dense<0.000000e+00> : vector<32xf32>
    %74 = vector.multi_reduction <add>, %73, %cst_19 [1] : vector<32x128xf32> to vector<32xf32>
    %75 = vector.shape_cast %74 : vector<32xf32> to vector<32x1xf32>
    %cst_20 = arith.constant -5.000000e-01 : f32
    %76 = vector.broadcast %cst_20 : f32 to vector<32x1xf32>
    %77 = arith.mulf %76, %75 : vector<32x1xf32>
    %cst_21 = arith.constant 0.918938517 : f32
    %78 = vector.broadcast %cst_21 : f32 to vector<32x1xf32>
    %79 = arith.addf %46, %78 : vector<32x1xf32>
    %cst_22 = arith.constant 5.000000e+01 : f32
    %80 = vector.broadcast %cst_22 : f32 to vector<32x1xf32>
    %81 = arith.mulf %80, %79 : vector<32x1xf32>
    %82 = arith.subf %77, %81 : vector<32x1xf32>
    %83 = arith.addf %63, %82 : vector<32x1xf32>
    %c50_i32_23 = arith.constant 50 : i32
    %84 = vector.broadcast %c50_i32_23 : i32 to vector<32x128xi32>
    %85 = arith.cmpi eq, %4, %84 : vector<32x128xi32>
    %86 = vector.shape_cast %45 : vector<32x1xf32> to vector<32x1xf32>
    %87 = vector.broadcast %86 : vector<32x1xf32> to vector<32x128xf32>
    %88 = arith.select %85, %87, %72 : vector<32x128xi1>, vector<32x128xf32>
    %c51_i32 = arith.constant 51 : i32
    %89 = vector.broadcast %c51_i32 : i32 to vector<32x128xi32>
    %90 = arith.cmpi eq, %4, %89 : vector<32x128xi32>
    %91 = vector.shape_cast %46 : vector<32x1xf32> to vector<32x1xf32>
    %92 = vector.broadcast %91 : vector<32x1xf32> to vector<32x128xf32>
    %93 = arith.select %90, %92, %88 : vector<32x128xi1>, vector<32x128xf32>
    %c52_i32 = arith.constant 52 : i32
    %94 = vector.broadcast %c52_i32 : i32 to vector<32x128xi32>
    %95 = arith.cmpi eq, %4, %94 : vector<32x128xi32>
    %96 = vector.shape_cast %83 : vector<32x1xf32> to vector<32x1xf32>
    %97 = vector.broadcast %96 : vector<32x1xf32> to vector<32x128xf32>
    %98 = arith.select %95, %97, %93 : vector<32x128xi1>, vector<32x128xf32>
    %c0_24 = arith.constant 0 : index
    %c0_25 = arith.constant 0 : index
    %99 = vector.load %arg3[%c0_24, %c0_25] : memref<32x128xf32, #tpu.memory_space<vmem>>, vector<32x128xf32>
    tpu.vector_store %arg3[%c0_24, %c0_25], %98 {strides = array<i32>} : memref<32x128xf32, #tpu.memory_space<vmem>>, vector<32x128xf32>,
    return
  }
  func.func @transform_0(%arg0: i32) -> (i32, i32) {
    %c0_i32 = arith.constant 0 : i32
    %c0_i32_0 = arith.constant 0 : i32
    %c0_i32_1 = arith.constant 0 : i32
    return %c0_i32, %c0_i32_0 : i32, i32
  }
  func.func @transform_1(%arg0: i32) -> (i32, i32) {
    %c0_i32 = arith.constant 0 : i32
    %c0_i32_0 = arith.constant 0 : i32
    return %arg0, %c0_i32 : i32, i32
  }
  func.func @transform_2(%arg0: i32) -> (i32, i32) {
    %c0_i32 = arith.constant 0 : i32
    %c0_i32_0 = arith.constant 0 : i32
    return %arg0, %c0_i32 : i32, i32
  }
}

</mosaic_0001>

<bundles_post_ra>
// kernel: tpu_custom_call.1
= control target key start
LH: loop header
LB: loop body
LE: loop exit
PB: predicated region body
PF: predicated region fallthrough
CT: control target
= control target key end

     0   :  { %7 = vsyncpa [#allocation3], 0  ;;  %s1273_s0 = inlined_call_operand.hbm [shape: f32[8,128], index: 0, kind: input, shape index: {}]   ;;  %s1274_s1 = inlined_call_operand.hbm [shape: f32[64,128], index: 1, kind: input, shape index: {}]   ;;  %s1275_s2 = inlined_call_operand.hbm [shape: f32[64,128], index: 2, kind: output, shape index: {}]  }
   0x1   :  { %8 = vsyncpa [#allocation6], 0 }
   0x2   :  { %10 = vsyncpa [#allocation6 + $0x1], 0 }
   0x3   :  { %11 = vsyncpa [#allocation4], 0 }
   0x4   :  { %13 = vsyncpa [#allocation4 + $0x1], 0  ;;  %s820_s9 = smov 0   ;;  %s822_s10 = smov 0  }
   0x5   :  { %s824_s11 = smov 0   ;;  %s826_s12 = smov 0  }
   0x6 LB: > { %s841_s13 = sadd.s32 4294967295, %s796_s12   ;;  %s579_s14 = sadd.s32 4294967294, %s796_s12   ;;  %s796_s12 = sphi %s826_s12, %s1312_s12   ;;  %s792_s11 = sphi %s824_s11, %s1311_s11   ;;  %s788_s10 = sphi %s822_s10, %s1310_s10   ;;  %s784_s9 = sphi %s820_s9, %s1309_s9  }
   0x7   : > { %s845_s15 = sadd.s32 1, %s796_s12   ;;  %s47_s16 = sadd.s32 1, %s792_s11 }
   0x8   : > { %s44_s17 = ssub.s32 %s796_s12, %s845_s15  ;;  %p54_p0 = scmp.ne.s32.totalorder %s792_s11, %s788_s10 }
   0x9   : > { %p45_p1 = scmp.eq.s32.totalorder %s44_s17, 0  ;;  %p55_p2 = scmp.eq.s32.totalorder %s796_s12, 0 }
   0xa   : > { %p60_p3 = scmp.ne.s32.totalorder %s788_s10, %s784_s9  ;;  %p1276_p4 = scmp.eq.s32.totalorder %s841_s13, 0 }
   0xb   : > { %s857_s18 = scalar_select %p45_p1, %s792_s11, %s47_s16  }
   0xc   : > { %p859_p5 = por %p55_p2, %p54_p0  ;;  %p865_p6 = por %p1276_p4, %p60_p3 }
   0xd   : > { %p84_p7 = scmp.eq.s32.totalorder %s841_s13, 1  ;;  %p90_p8 = scmp.eq.s32.totalorder %s579_s14, 1 }
   0xe   : > { %s1282_s20 = scalar_select %p865_p6, 1, 0 }
   0xf   : > { %p580_p9 = scmp.ge.s32.totalorder %s796_s12, 1  ;;  %p97_p10 = scmp.lt.s32.totalorder %s796_s12, 3 }
  0x10   : > { %p872_p11 = por %p84_p7, %p54_p0  ;;  %p876_p12 = por %p90_p8, %p60_p3 }
  0x11   : > { %p880_p13 = pnand %p580_p9, %p97_p10  ;;  %s798_s24 = smov [#allocation2]  }
  0x12   : > { %s1283_s21 = scalar_select %p872_p11, 1, 0 }
  0x13   : > { %s1284_s22 = scalar_select %p876_p12, 1, 0 }
  0x14   : > { %s1285_s23 = scalar_select %p880_p13, 1, 0 }
  0x15   : > { %p607_p2 = pneg %p880_p13  ;;  %s110_s25 = sshll.u32 %s798_s24, 4  ;;  %s111_s25 = int_to_ptr.vmem [resolvable:$true] %s110_s25 }
  0x16   : > { %p620_p4 = scmp.lt.s32.totalorder %s796_s12, 2  ;;  %p1286_p0 = scmp.eq.s32.totalorder %s841_s13, 0 }
  0x17   : > { %s121_s27 = sand.u32 1, %s792_s11   ;;  %s668_s4 = scalar_lea.hbm %s1273_s0, 128 }
  0x18   : > { %p890_p7 = pnand %p607_p2, %p1286_p0  ;;  %p897_p3 = pnand %p620_p4, %p859_p5 }
  0x19   : > { %s583_s29 = sshll.u32 %s121_s27, 5  ;;  %p669_p8 = scmp.ne.s32.totalorder %s1273_s0, %s668_s4 }
  0x1a   : > { %s1288_s28 = scalar_select %p897_p3, 1, 0 }
  0x1b   : > { %p670_p9 = pneg %p890_p7  ;;  %p675_p4 = scmp.lt.u32.totalorder %s668_s4, %s1273_s0 }
  0x1d   : > { %p671_p10 = pnand %p670_p9, %p669_p8 }
  0x1f   : > { %p672_p2 = pneg %p671_p10 }
  0x21   : > { %p677_p5 = pnand %p675_p4, %p672_p2 }
  0x23   : > { %680 = shalt.err (!%p677_p5)
}
  0x24   : > { %s681_s14 = scalar_lea.vmem %s111_s25, 128  ;;  %p689_p11 = scmp.lt.s32.totalorder %s111_s25, %s111_s25 }
  0x25   : > { %p682_p0 = scmp.ne.s32.totalorder %s111_s25, %s681_s14  ;;  %p690_p6 = scmp.lt.s32.totalorder %s681_s14, %s681_s14 }
  0x27   : > { %p684_p1 = pnand %p682_p0, %p670_p9  ;;  %p691_p13 = por %p690_p6, %p689_p11 }
  0x29   : > { %p685_p12 = pneg %p684_p1 }
  0x2b   : > { %p692_p3 = pnand %p691_p13, %p685_p12 }
  0x2d   : > { %695 = shalt.err (!%p692_p3)
}
  0x2e   : > { %610 = dma.hbm_to_vmem [thread:$0]  (!%p890_p7), %s1273_s0, 128, %s111_s25, [#allocation3]  }
  0x2f   : > { %s597_s19 = sshll.u32 %s796_s12, 9  ;;  %s125_s24 = scalar_lea.vmem [#allocation5], %s583_s29 }
  0x30   : > { %s132_s30 = sshll.u32 %s125_s24, 4  ;;  %s921_s5 = scalar_lea.hbm %s1274_s1, %s597_s19  ;;  %s923_s30 = int_to_ptr.vmem [resolvable:$true] %s132_s30 }
  0x31   : > { %s925_s26 = scalar_lea.sflag [#allocation6], %s121_s27  ;;  %s696_s6 = scalar_lea.hbm %s921_s5, 512 }
  0x32   : > { %p697_p6 = scmp.ne.s32.totalorder %s921_s5, %s696_s6  ;;  %p1289_p11 = scmp.ne.s32.totalorder %s1288_s28, 0 }
  0x33   : > { %s701_s7 = scalar_lea.hbm %s1274_s1, 1024  ;;  %p702_p7 = scmp.lt.u32.totalorder %s921_s5, %s1274_s1 }
  0x34   : > { %p698_p12 = pneg %p1289_p11  ;;  %p703_p3 = scmp.lt.u32.totalorder %s701_s7, %s696_s6 }
  0x35   : > { %p705_p9 = scmp.lt.u32.totalorder %s696_s6, %s921_s5 }
  0x36   : > { %p699_p13 = pnand %p698_p12, %p697_p6  ;;  %p704_p8 = por %p703_p3, %p702_p7 }
  0x38   : > { %p700_p1 = pneg %p699_p13  ;;  %p706_p10 = por %p705_p9, %p704_p8 }
  0x3a   : > { %p707_p2 = pnand %p706_p10, %p700_p1 }
  0x3c   : > { %710 = shalt.err (!%p707_p2)
}
  0x3d   : > { %s711_s27 = scalar_lea.vmem %s923_s30, 512  ;;  %s799_s16 = smov [#allocation5]  }
  0x3e   : > { %p712_p4 = scmp.ne.s32.totalorder %s923_s30, %s711_s27  ;;  %s716_s17 = sshll.u32 %s799_s16, 4  ;;  %s717_s17 = int_to_ptr.vmem [resolvable:$false] %s716_s17 }
  0x3f   : > { %s718_s19 = scalar_lea.vmem %s717_s17, 1024  ;;  %p719_p6 = scmp.lt.s32.totalorder %s923_s30, %s717_s17 }
  0x40   : > { %p714_p5 = pnand %p712_p4, %p698_p12  ;;  %p720_p13 = scmp.lt.s32.totalorder %s718_s19, %s711_s27 }
  0x42   : > { %p715_p0 = pneg %p714_p5  ;;  %p721_p7 = por %p720_p13, %p719_p6 }
  0x44   : > { %p722_p3 = pnand %p721_p7, %p715_p0 }
  0x46   : > { %725 = shalt.err (!%p722_p3)
}
  0x47   : > { %s800_s24 = smov 128   ;;  %s801_s3 = smov 8  }
  0x48   : > { %614 = dma.hbm_to_vmem [thread:$0]  (!%p1289_p11), %s921_s5, 512, %s923_s30, %s925_s26, %s800_s24, %s800_s24, %s801_s3  }
  0x49   : > { %p1290_p12 = scmp.ne.s32.totalorder %s1285_s23, 0 }
  0x4a   : > { %p1291_p1 = scmp.eq.s32.totalorder (!%p1290_p12), %s841_s13, 0 }
  0x4b   : > { %144 = sbr.rel (%p1290_p12) target bundleno = 718 (0x2ce), region = 28 }
  0x52   : > { %771 = dma.done.wait (%p1291_p1), [#allocation3], 128   ;;  %p1292_p8 = pmov %p1291_p1 }
  0x53   : > { %s960_s4 = sand.u32 1, %s788_s10   ;;  %p1293_p11 = scmp.ne.s32.totalorder %s1282_s20, 0 }
  0x54   : > { %773 = vsyncadd (%p1292_p8), [#allocation3], 4294967168  ;;  %s588_s6 = sshll.u32 %s960_s4, 5  ;;  %s151_s25 = scalar_lea.sflag [#allocation6], %s960_s4 }
  0x55   : > { %s154_s28 = scalar_lea.vmem [#allocation5], %s588_s6 }
  0x56   : > { %775 = dma.done.wait (%p1293_p11), %s151_s25, 512  }
  0x57   : > { %777 = vsyncadd (%p1293_p11), %s151_s25, 4294966784  ;;  %v182_v0 = vlaneseq  ;;  %v977_v4 = vld [vmem:[#allocation2] sm:$0xff]  ;;  %v979_v5 = vld [vmem:[%s154_s28] sm:$0xff]  ;;  %s174_s20 = scalar_lea.vmem [#allocation7], %s588_s6  ;;  %s598_s30 = sshll.u32 %s841_s13, 9 }
  0x58   : > { %v981_v6 = vld [vmem:[%s154_s28 + $0x10] sm:$0xff]  ;;  %v984_v8 = vld [vmem:[%s154_s28 + $0x8] sm:$0xff]  ;;  %v986_v9 = vld [vmem:[%s154_s28 + $0x18] sm:$0xff]  ;;  %s494_s23 = sshll.u32 %s174_s20, 4  ;;  %s1227_s13 = scalar_lea.hbm %s1275_s2, %s598_s30  ;;  %s1220_s23 = int_to_ptr.vmem [resolvable:$true] %s494_s23 }
  0x59   : > { %v970_v1 = vand.u32 127, %v182_v0  ;;  %v972_v2 = vshrl.u32 %v182_v0, 7  ;;  %s481_s29 = scalar_lea.sflag [#allocation4], %s960_s4  ;;  %s726_s7 = scalar_lea.vmem %s1220_s23, 512 }
  0x5a   : > { %p727_p9 = scmp.ne.s32.totalorder %s1220_s23, %s726_s7  ;;  %p1306_p10 = scmp.ne.s32.totalorder %s1283_s21, 0 }
  0x5b   : > { %v193_v3 = vsub.s32 0, %v972_v2  ;;  %vm185_vm0 = vcmp.ge.s32.totalorder %v970_v1, 50  ;;  %vm186_vm1 = vcmp.lt.s32.totalorder %v970_v1, 55  ;;  %vm188_vm3 = vcmp.ge.s32.totalorder %v970_v1, 55  ;;  %s802_s8 = smov [#allocation7]  }
  0x5c   : > { %vm988_vm2 = vmand %vm185_vm0, %vm186_vm1  ;;  %vm189_vm4 = vcmp.lt.s32.totalorder %v970_v1, 60  ;;  %v1027_v24 = vadd.s32 4294967246, %v970_v1  ;;  %v1043_v35 = vadd.s32 4294967241, %v970_v1  ;;  %p728_p2 = pnand %p727_p9, %p1306_p10  ;;  %s730_s14 = sshll.u32 %s802_s8, 4  ;;  %s731_s14 = int_to_ptr.vmem [resolvable:$false] %s730_s14 }
  0x5d   : > { %v194_v7 = vrot.slane %v977_v4, %v193_v3  ;;  %vm1012_vm5 = vmand %vm188_vm3, %vm189_vm4  ;;  %s732_s27 = scalar_lea.vmem %s731_s14, 1024  ;;  %p733_p5 = scmp.lt.s32.totalorder %s1220_s23, %s731_s14 }
  0x5e   : > { %p729_p4 = pneg %p728_p2  ;;  %p734_p0 = scmp.lt.s32.totalorder %s732_s27, %s726_s7 }
  0x5f   : > { %v195_v11 = vadd.f32 %v194_v7, %v979_v5  ;;  %v994_v12 = vadd.f32 %v194_v7, %v981_v6  ;;  %v196_v13 = vadd.f32 %v194_v7, %v984_v8  ;;  %v998_v14 = vadd.f32 %v194_v7, %v986_v9 }
  0x60   : > { %p735_p6 = por %p734_p0, %p733_p5 }
  0x61   : > { %v199_v15 = vsel %vm988_vm2, %v195_v11, -inf  ;;  %v201_v16 = vsel %vm988_vm2, %v994_v12, -inf  ;;  %v200_v17 = vsel %vm988_vm2, %v196_v13, -inf  ;;  %v202_v18 = vsel %vm988_vm2, %v998_v14, -inf }
  0x62   : > { %203 = vmax.xlane.f32.xlu0 %v199_v15  ;;  %207 = vmax.xlane.f32.xlu1 %v201_v16  ;;  %v211_v20 = vsel %vm1012_vm5, %v195_v11, -inf  ;;  %v212_v21 = vsel %vm1012_vm5, %v196_v13, -inf  ;;  %v213_v22 = vsel %vm1012_vm5, %v994_v12, -inf  ;;  %v214_v23 = vsel %vm1012_vm5, %v998_v14, -inf  ;;  %p736_p13 = pnand %p735_p6, %p729_p4 }
  0x66   : > { %205 = vmax.xlane.f32.xlu0 %v200_v17  ;;  %209 = vmax.xlane.f32.xlu1 %v202_v18 }
  0x6a   : > { %215 = vmax.xlane.f32.xlu0 %v211_v20  ;;  %217 = vmax.xlane.f32.xlu1 %v212_v21 }
  0x6e   : > { %219 = vmax.xlane.f32.xlu0 %v213_v22  ;;  %221 = vmax.xlane.f32.xlu1 %v214_v23 }
  0xef   : > { %v204_v25 = vpop.xlane.xlu0 %203  ;;  %v208_v26 = vpop.xlane.xlu1 %207 }
  0xf0   : > { %vm223_vm6 = vcmp.ge.f32.partialorder %v195_v11, %v204_v25  ;;  %vm225_vm7 = vcmp.ge.f32.partialorder %v994_v12, %v208_v26 }
  0xf1   : > { %vm227_vm8 = vmand %vm988_vm2, %vm223_vm6 }
  0xf2   : > { %v232_v27 = vsel %vm227_vm8, %v1027_v24, 1073741824  ;;  %vm229_vm9 = vmand %vm988_vm2, %vm225_vm7 }
  0xf3   : > { %v234_v28 = vsel %vm229_vm9, %v1027_v24, 1073741824  ;;  %v206_v29 = vpop.xlane.xlu0 %205  ;;  %v210_v30 = vpop.xlane.xlu1 %209  ;;  %v237_v31 = vshra.s32 %v232_v27, 16  ;;  %v236_v58 = vand.u32 65535, %v232_v27 }
  0xf4   : > { %vm224_vm10 = vcmp.ge.f32.partialorder %v196_v13, %v206_v29  ;;  %vm226_vm11 = vcmp.ge.f32.partialorder %v998_v14, %v210_v30  ;;  %v265_v32 = vshra.s32 %v234_v28, 16  ;;  %v264_v62 = vand.u32 65535, %v234_v28 }
  0xf5   : > { %vm228_vm12 = vmand %vm988_vm2, %vm224_vm10  ;;  %v239_v33 = vcvt.s32.f32 %v237_v31  ;;  %v238_v60 = vcvt.s32.f32 %v236_v58 }
  0xf6   : > { %v233_v34 = vsel %vm228_vm12, %v1027_v24, 1073741824  ;;  %vm230_vm13 = vmand %vm988_vm2, %vm226_vm11  ;;  %v267_v39 = vcvt.s32.f32 %v265_v32 }
  0xf7   : > { %v235_v36 = vsel %vm230_vm13, %v1027_v24, 1073741824  ;;  %240 = vmin.xlane.f32.xlu0 %v239_v33  ;;  %v216_v37 = vpop.xlane.xlu0 %215  ;;  %v218_v38 = vpop.xlane.xlu1 %217  ;;  %v251_v40 = vshra.s32 %v233_v34, 16  ;;  %v250_v61 = vand.u32 65535, %v233_v34  ;;  %vm184_vm13 = vcmp.lt.s32.totalorder %v970_v1, 50 }
  0xf8   : > { %vm292_vm14 = vcmp.ge.f32.partialorder %v195_v11, %v216_v37  ;;  %vm293_vm15 = vcmp.ge.f32.partialorder %v196_v13, %v218_v38  ;;  %v279_v41 = vshra.s32 %v235_v36, 16  ;;  %v266_v11 = vcvt.s32.f32 %v264_v62 }
  0xf9   : > { %vm296_vm0 = vmand %vm1012_vm5, %vm292_vm14  ;;  %v253_v42 = vcvt.s32.f32 %v251_v40  ;;  %v252_v7 = vcvt.s32.f32 %v250_v61  ;;  %v1070_v31 = vsel %vm184_vm13, %v979_v5, 0.0  ;;  %v1079_v38 = vsel %vm184_vm13, %v984_v8, 0.0 }
  0xfa   : > { %v301_v43 = vsel %vm296_vm0, %v1043_v35, 1073741824  ;;  %vm297_vm1 = vmand %vm1012_vm5, %vm293_vm15  ;;  %v281_v47 = vcvt.s32.f32 %v279_v41  ;;  %v429_v34 = vmul.f32 %v1070_v31, %v1070_v31  ;;  %v1084_v5 = vsel %vm184_vm13, %v981_v6, 0.0 }
  0xfb   : > { %v302_v44 = vsel %vm297_vm1, %v1043_v35, 1073741824  ;;  %268 = vmin.xlane.f32.xlu0 %v267_v39  ;;  %254 = vmin.xlane.f32.xlu1 %v253_v42  ;;  %v220_v45 = vpop.xlane.xlu0 %219  ;;  %v222_v46 = vpop.xlane.xlu1 %221  ;;  %v306_v48 = vshra.s32 %v301_v43, 16  ;;  %v305_v13 = vand.u32 65535, %v301_v43  ;;  %v430_v40 = vmul.f32 %v1079_v38, %v1079_v38 }
  0xfc   : > { %vm294_vm3 = vcmp.ge.f32.partialorder %v994_v12, %v220_v45  ;;  %vm295_vm4 = vcmp.ge.f32.partialorder %v998_v14, %v222_v46  ;;  %v320_v49 = vshra.s32 %v302_v44, 16  ;;  %v278_v12 = vand.u32 65535, %v235_v36 }
  0xfd   : > { %vm298_vm6 = vmand %vm1012_vm5, %vm294_vm3  ;;  %v308_v50 = vcvt.s32.f32 %v306_v48  ;;  %v307_v20 = vcvt.s32.f32 %v305_v13  ;;  %v319_v21 = vand.u32 65535, %v302_v44  ;;  %v431_v41 = vmul.f32 %v1084_v5, %v1084_v5 }
  0xfe   : > { %v303_v51 = vsel %vm298_vm6, %v1043_v35, 1073741824  ;;  %vm299_vm7 = vmand %vm1012_vm5, %vm295_vm4  ;;  %v322_v53 = vcvt.s32.f32 %v320_v49  ;;  %v280_v18 = vcvt.s32.f32 %v278_v12  ;;  %v1094_v8 = vsel %vm184_vm13, %v986_v9, 0.0 }
  0xff   : > { %v304_v52 = vsel %vm299_vm7, %v1043_v35, 1073741824  ;;  %282 = vmin.xlane.f32.xlu1 %v281_v47  ;;  %309 = vmin.xlane.f32.xlu0 %v308_v50  ;;  %v334_v54 = vshra.s32 %v303_v51, 16  ;;  %v333_v22 = vand.u32 65535, %v303_v51  ;;  %v321_v28 = vcvt.s32.f32 %v319_v21 }
 0x100   : > { %v348_v55 = vshra.s32 %v304_v52, 16  ;;  %v347_v30 = vand.u32 65535, %v304_v52  ;;  %v432_v6 = vmul.f32 %v1094_v8, %v1094_v8 }
 0x101   : > { %v336_v56 = vcvt.s32.f32 %v334_v54  ;;  %v335_v29 = vcvt.s32.f32 %v333_v22 }
 0x102   : > { %v350_v57 = vcvt.s32.f32 %v348_v55  ;;  %v349_v37 = vcvt.s32.f32 %v347_v30 }
 0x103   : > { %323 = vmin.xlane.f32.xlu1 %v322_v53  ;;  %337 = vmin.xlane.f32.xlu0 %v336_v56 }
 0x107   : > { %351 = vmin.xlane.f32.xlu1 %v350_v57 }
 0x184   : > { %v1060_v59 = vpop.xlane.xlu0 %240 }
 0x185   : > { %vm242_vm8 = vcmp.eq.f32.partialorder %v239_v33, %v1060_v59 }
 0x186   : > { %v243_v63 = vsel %vm242_vm8, %v238_v60, inf }
 0x187   : > { %244 = vmin.xlane.f32.xlu0 %v243_v63 }
 0x188   : > { %v255_v0 = vpop.xlane.xlu1 %254  ;;  %v1063_v3 = vpop.xlane.xlu0 %268 }
 0x189   : > { %vm256_vm9 = vcmp.eq.f32.partialorder %v253_v42, %v255_v0  ;;  %vm270_vm10 = vcmp.eq.f32.partialorder %v267_v39, %v1063_v3  ;;  %v247_v42 = vcvt.f32.s32 %v1060_v59  ;;  %v261_v44 = vcvt.f32.s32 %v255_v0 }
 0x18a   : > { %v257_v14 = vsel %vm256_vm9, %v252_v7, inf  ;;  %v271_v15 = vsel %vm270_vm10, %v266_v11, inf  ;;  %v391_v7 = vsub.s32 1, %v972_v2 }
 0x18b   : > { %258 = vmin.xlane.f32.xlu1 %v257_v14  ;;  %272 = vmin.xlane.f32.xlu0 %v271_v15  ;;  %v248_v46 = vshll.u32 %v247_v42, 16  ;;  %v262_v51 = vshll.u32 %v261_v44, 16 }
 0x18c   : > { %v283_v16 = vpop.xlane.xlu1 %282  ;;  %v310_v17 = vpop.xlane.xlu0 %309  ;;  %v392_v22 = vrot.slane %v977_v4, %v391_v7 }
 0x18d   : > { %vm284_vm11 = vcmp.eq.f32.partialorder %v281_v47, %v283_v16  ;;  %vm311_vm12 = vcmp.eq.f32.partialorder %v308_v50, %v310_v17  ;;  %v275_v47 = vcvt.f32.s32 %v1063_v3  ;;  %v289_v48 = vcvt.f32.s32 %v283_v16 }
 0x18e   : > { %v285_v23 = vsel %vm284_vm11, %v280_v18, inf  ;;  %v312_v25 = vsel %vm311_vm12, %v307_v20, inf  ;;  %v316_v9 = vcvt.f32.s32 %v310_v17 }
 0x18f   : > { %286 = vmin.xlane.f32.xlu1 %v285_v23  ;;  %313 = vmin.xlane.f32.xlu0 %v312_v25 }
 0x190   : > { %v324_v26 = vpop.xlane.xlu1 %323  ;;  %v338_v27 = vpop.xlane.xlu0 %337  ;;  %v317_v61 = vshll.u32 %v316_v9, 16 }
 0x191   : > { %vm325_vm14 = vcmp.eq.f32.partialorder %v322_v53, %v324_v26  ;;  %vm339_vm15 = vcmp.eq.f32.partialorder %v336_v56, %v338_v27  ;;  %v276_v56 = vshll.u32 %v275_v47, 16  ;;  %v330_v58 = vcvt.f32.s32 %v324_v26 }
 0x192   : > { %v326_v32 = vsel %vm325_vm14, %v321_v28, inf  ;;  %v340_v33 = vsel %vm339_vm15, %v335_v29, inf  ;;  %v344_v62 = vcvt.f32.s32 %v338_v27 }
 0x193   : > { %327 = vmin.xlane.f32.xlu1 %v326_v32  ;;  %341 = vmin.xlane.f32.xlu0 %v340_v33  ;;  %v331_v13 = vshll.u32 %v330_v58, 16 }
 0x194   : > { %v1074_v36 = vpop.xlane.xlu1 %351  ;;  %v345_v17 = vshll.u32 %v344_v62, 16 }
 0x195   : > { %vm353_vm0 = vcmp.eq.f32.partialorder %v350_v57, %v1074_v36  ;;  %v290_v57 = vshll.u32 %v289_v48, 16  ;;  %v358_v14 = vcvt.f32.s32 %v1074_v36 }
 0x196   : > { %v354_v39 = vsel %vm353_vm0, %v349_v37, inf }
 0x197   : > { %355 = vmin.xlane.f32.xlu1 %v354_v39  ;;  %433 = vadd.xlane.f32.xlu0 %v429_v34  ;;  %v359_v4 = vshll.u32 %v358_v14, 16 }
 0x19b   : > { %435 = vadd.xlane.f32.xlu1 %v430_v40  ;;  %437 = vadd.xlane.f32.xlu0 %v431_v41 }
 0x19f   : > { %439 = vadd.xlane.f32.xlu1 %v432_v6 }
 0x214   : > { %v245_v43 = vpop.xlane.xlu0 %244 }
 0x215   : > { %v246_v45 = vcvt.f32.s32 %v245_v43 }
 0x217   : > { %v1100_v53 = vadd.s32 %v248_v46, %v246_v45 }
 0x218   : > { %v259_v49 = vpop.xlane.xlu1 %258  ;;  %v273_v50 = vpop.xlane.xlu0 %272 }
 0x219   : > { %v260_v52 = vcvt.f32.s32 %v259_v49  ;;  %v274_v54 = vcvt.f32.s32 %v273_v50  ;;  %vm369_vm1 = vcmp.eq.s32.totalorder %v1027_v24, %v1100_v53  ;;  %v361_v44 = vcvt.s32.f32 %v1100_v53 }
 0x21a   : > { %vm1118_vm4 = vmand %vm988_vm2, %vm369_vm1 }
 0x21b   : > { %v1102_v55 = vadd.s32 %v262_v51, %v260_v52  ;;  %v1104_v3 = vadd.s32 %v276_v56, %v274_v54 }
 0x21c   : > { %v287_v59 = vpop.xlane.xlu1 %286  ;;  %v314_v60 = vpop.xlane.xlu0 %313 }
 0x21d   : > { %v288_v63 = vcvt.f32.s32 %v287_v59  ;;  %v315_v0 = vcvt.f32.s32 %v314_v60  ;;  %vm370_vm3 = vcmp.eq.s32.totalorder %v1027_v24, %v1102_v55  ;;  %vm371_vm8 = vcmp.eq.s32.totalorder %v1027_v24, %v1104_v3 }
 0x21e   : > { %vm1126_vm7 = vmand %vm988_vm2, %vm370_vm3  ;;  %v362_v47 = vcvt.s32.f32 %v1102_v55  ;;  %v363_v50 = vcvt.s32.f32 %v1104_v3 }
 0x21f   : > { %v1109_v11 = vadd.s32 %v290_v57, %v288_v63  ;;  %v318_v12 = vadd.s32 %v317_v61, %v315_v0  ;;  %vm1145_vm12 = vmand %vm988_vm2, %vm371_vm8 }
 0x220   : > { %v328_v15 = vpop.xlane.xlu1 %327  ;;  %v342_v16 = vpop.xlane.xlu0 %341 }
 0x221   : > { %v1114_v18 = vcvt.s32.f32 %v318_v12  ;;  %v329_v20 = vcvt.f32.s32 %v328_v15  ;;  %v343_v21 = vcvt.f32.s32 %v342_v16  ;;  %vm377_vm6 = vcmp.eq.s32.totalorder %v1043_v35, %v318_v12 }
 0x222   : > { %vm381_vm9 = vmand %vm1012_vm5, %vm377_vm6  ;;  %vm372_vm10 = vcmp.eq.s32.totalorder %v1027_v24, %v1109_v11  ;;  %v364_v55 = vcvt.s32.f32 %v1109_v11 }
 0x223   : > { %v409_v25 = vmul.f32 1.442695, %v1114_v18  ;;  %v332_v26 = vadd.s32 %v331_v13, %v329_v20  ;;  %v346_v27 = vadd.s32 %v345_v17, %v343_v21  ;;  %vm385_vm11 = vmor %vm1118_vm4, %vm381_vm9  ;;  %vm461_vm9 = vcmp.eq.s32.totalorder %v970_v1, 50 }
 0x224   : > { %v356_v28 = vpop.xlane.xlu1 %355  ;;  %v393_v34 = vsel %vm385_vm11, %v392_v22, 0.0  ;;  %vm1153_vm0 = vmand %vm988_vm2, %vm372_vm10  ;;  %vm466_vm10 = vcmp.eq.s32.totalorder %v970_v1, 51  ;;  %v434_v0 = vpop.xlane.xlu0 %433  ;;  %v445_v3 = vadd.f32 0.9189385, %v1114_v18 }
 0x225   : > { %660 = vpow2.f32 %v409_v25  ;;  %v1139_v29 = vcvt.s32.f32 %v332_v26  ;;  %v1141_v30 = vcvt.s32.f32 %v346_v27  ;;  %v357_v32 = vcvt.f32.s32 %v356_v28  ;;  %397 = vadd.xlane.f32.xlu0 %v393_v34 }
 0x226   : > { %vm378_vm14 = vcmp.eq.s32.totalorder %v1043_v35, %v332_v26  ;;  %vm379_vm15 = vcmp.eq.s32.totalorder %v1043_v35, %v346_v27  ;;  %v441_v11 = vmul.f32 -0.5, %v434_v0  ;;  %v449_v12 = vmul.f32 50.0, %v445_v3 }
 0x227   : > { %v411_v36 = vmul.f32 1.442695, %v1139_v29  ;;  %v413_v37 = vmul.f32 1.442695, %v1141_v30  ;;  %v360_v39 = vadd.s32 %v359_v4, %v357_v32  ;;  %vm382_vm1 = vmand %vm1012_vm5, %vm378_vm14  ;;  %v446_v13 = vadd.f32 0.9189385, %v1139_v29 }
 0x228   : > { %vm386_vm3 = vmor %vm1126_vm7, %vm382_vm1  ;;  %v436_v7 = vpop.xlane.xlu1 %435  ;;  %v438_v14 = vpop.xlane.xlu0 %437  ;;  %v447_v15 = vadd.f32 0.9189385, %v1141_v30  ;;  %v453_v17 = vsub.f32 %v441_v11, %v449_v12 }
 0x229   : > { %662 = vpow2.f32 %v411_v36  ;;  %v368_v40 = vcvt.s32.f32 %v360_v39  ;;  %vm383_vm2 = vmand %vm1012_vm5, %vm379_vm15  ;;  %v394_v10 = vsel %vm386_vm3, %v392_v22, 0.0  ;;  %vm380_vm6 = vcmp.eq.s32.totalorder %v1043_v35, %v360_v39 }
 0x22a   : > { %664 = vpow2.f32 %v413_v37  ;;  %vm387_vm4 = vmor %vm1145_vm12, %vm383_vm2  ;;  %399 = vadd.xlane.f32.xlu1 %v394_v10  ;;  %v442_v16 = vmul.f32 -0.5, %v436_v7  ;;  %v450_v20 = vmul.f32 50.0, %v446_v13  ;;  %v443_v2 = vmul.f32 -0.5, %v438_v14 }
 0x22b   : > { %v415_v41 = vmul.f32 1.442695, %v368_v40  ;;  %v395_v6 = vsel %vm387_vm4, %v392_v22, 0.0  ;;  %vm384_vm8 = vmand %vm1012_vm5, %vm380_vm6  ;;  %v448_v21 = vadd.f32 0.9189385, %v368_v40  ;;  %vm471_vm5 = vcmp.eq.s32.totalorder %v970_v1, 52 }
 0x22c   : > { %401 = vadd.xlane.f32.xlu0 %v395_v6  ;;  %vm388_vm7 = vmor %vm1153_vm0, %vm384_vm8  ;;  %v454_v4 = vsub.f32 %v442_v16, %v450_v20 }
 0x22d   : > { %666 = vpow2.f32 %v415_v41  ;;  %v396_v42 = vsel %vm388_vm7, %v392_v22, 0.0  ;;  %v440_v22 = vpop.xlane.xlu1 %439  ;;  %v452_v28 = vmul.f32 50.0, %v448_v21 }
 0x22e   : > { %403 = vadd.xlane.f32.xlu1 %v396_v42  ;;  %v444_v26 = vmul.f32 -0.5, %v440_v22 }
 0x22f   : > { %v661_v43 = vpop.eup %660 }
 0x230   : > { %v417_v45 = vmul.f32 %v661_v43, %v1070_v31  ;;  %v456_v36 = vsub.f32 %v444_v26, %v452_v28 }
 0x232   : > { %v421_v46 = vadd.f32 %v417_v45, %v361_v44 }
 0x233   : > { %v663_v35 = vpop.eup %662 }
 0x234   : > { %v665_v19 = vpop.eup %664  ;;  %v425_v48 = vsel %vm184_vm13, %v421_v46, 0.0  ;;  %v418_v49 = vmul.f32 %v663_v35, %v1079_v38 }
 0x235   : > { %v462_v51 = vsel %vm461_vm9, %v361_v44, %v425_v48  ;;  %v419_v31 = vmul.f32 %v665_v19, %v1084_v5 }
 0x236   : > { %v467_v9 = vsel %vm466_vm10, %v1114_v18, %v462_v51  ;;  %v422_v52 = vadd.f32 %v418_v49, %v362_v47  ;;  %v451_v18 = vmul.f32 50.0, %v447_v15 }
 0x237   : > { %v667_v53 = vpop.eup %666  ;;  %v423_v54 = vadd.f32 %v419_v31, %v363_v50 }
 0x238   : > { %v426_v56 = vsel %vm184_vm13, %v422_v52, 0.0  ;;  %v420_v38 = vmul.f32 %v667_v53, %v1094_v8 }
 0x239   : > { %v463_v57 = vsel %vm461_vm9, %v362_v47, %v426_v56  ;;  %v427_v5 = vsel %vm184_vm13, %v423_v54, 0.0 }
 0x23a   : > { %v468_v58 = vsel %vm466_vm10, %v1139_v29, %v463_v57  ;;  %v464_v59 = vsel %vm461_vm9, %v363_v50, %v427_v5  ;;  %v424_v60 = vadd.f32 %v420_v38, %v364_v55 }
 0x23b   : > { %v469_v61 = vsel %vm466_vm10, %v1141_v30, %v464_v59  ;;  %v455_v30 = vsub.f32 %v443_v2, %v451_v18 }
 0x23c   : > { %v428_v8 = vsel %vm184_vm13, %v424_v60, 0.0 }
 0x23d   : > { %v465_v62 = vsel %vm461_vm9, %v364_v55, %v428_v8 }
 0x23e   : > { %v470_v63 = vsel %vm466_vm10, %v368_v40, %v465_v62 }
 0x2b2   : > { %v398_v23 = vpop.xlane.xlu0 %397 }
 0x2b3   : > { %v457_v25 = vadd.f32 %v453_v17, %v398_v23 }
 0x2b5   : > { %v472_v27 = vsel %vm471_vm5, %v457_v25, %v467_v9 }
 0x2b6   : > { %476 = vst [vmem:[%s174_s20] sm:$0xff] %v472_v27 }
 0x2b7   : > { %v400_v29 = vpop.xlane.xlu1 %399 }
 0x2b8   : > { %v458_v32 = vadd.f32 %v454_v4, %v400_v29 }
 0x2b9   : > { %v402_v33 = vpop.xlane.xlu0 %401 }
 0x2ba   : > { %v459_v34 = vadd.f32 %v455_v30, %v402_v33  ;;  %v473_v24 = vsel %vm471_vm5, %v458_v32, %v468_v58 }
 0x2bb   : > { %477 = vst [vmem:[%s174_s20 + $0x8] sm:$0xff] %v473_v24  ;;  %v404_v39 = vpop.xlane.xlu1 %403 }
 0x2bc   : > { %v474_v37 = vsel %vm471_vm5, %v459_v34, %v469_v61  ;;  %v460_v40 = vadd.f32 %v456_v36, %v404_v39 }
 0x2bd   : > { %478 = vst [vmem:[%s174_s20 + $0x10] sm:$0xff] %v474_v37 }
 0x2be   : > { %v475_v10 = vsel %vm471_vm5, %v460_v40, %v470_v63 }
 0x2bf   : > { %479 = vst [vmem:[%s174_s20 + $0x18] sm:$0xff] %v475_v10 }
 0x2c0   : > { %739 = shalt.err (!%p736_p13)
}
 0x2c1   : > { %s740_s16 = scalar_lea.hbm %s1227_s13, 512  ;;  %s744_s24 = scalar_lea.hbm %s1275_s2, 1024 }
 0x2c2   : > { %p741_p7 = scmp.ne.s32.totalorder %s1227_s13, %s740_s16  ;;  %p745_p1 = scmp.lt.u32.totalorder %s1227_s13, %s1275_s2 }
 0x2c3   : > { %p746_p8 = scmp.lt.u32.totalorder %s744_s24, %s740_s16  ;;  %p748_p9 = scmp.lt.u32.totalorder %s740_s16, %s1227_s13 }
 0x2c4   : > { %p742_p3 = pnand %p741_p7, %p1306_p10 }
 0x2c5   : > { %p747_p11 = por %p746_p8, %p745_p1 }
 0x2c6   : > { %p743_p12 = pneg %p742_p3 }
 0x2c7   : > { %p749_p2 = por %p748_p9, %p747_p11 }
 0x2c9   : > { %p750_p4 = pnand %p749_p2, %p743_p12 }
 0x2cb   : > { %753 = shalt.err (!%p750_p4)
}
 0x2cc   : > { %s803_s25 = smov 128   ;;  %s804_s28 = smov 8  }
 0x2cd   : > { %605 = dma.vmem_to_hbm [thread:$0]  (%p1306_p10), %s1220_s23, 512, %s1227_s13, %s481_s29, %s803_s25, %s803_s25, %s804_s28  }
 0x2ce PF: > { %s509_s20 = sand.u32 1, %s784_s9   ;;  %p1307_p5 = scmp.ne.s32.totalorder %s1284_s22, 0 }
 0x2cf   : > { %p1308_p0 = scmp.ge.s32.totalorder %s796_s12, 2  ;;  %s510_s30 = scalar_lea.sflag [#allocation4], %s509_s20 }
 0x2d1   : > { %p616_p6 = pnand %p1308_p0, %p1307_p5 }
 0x2d3   : > { %779 = dma.done.wait (!%p616_p6), %s510_s30, 512  }
 0x2d4   : > { %781 = vsyncadd (!%p616_p6), %s510_s30, 4294966784  ;;  %p16_p13 = scmp.ge.s32.totalorder %s845_s15, 4   ;;  %s1309_s9 = smov %s788_s10 }
 0x2d5   : > { %s1310_s10 = smov %s792_s11  ;;  %s1311_s11 = smov %s857_s18 }
 0x2d6   : > { %s1312_s12 = smov %s845_s15  ;;  %18 = sbr.rel (!%p16_p13) target bundleno = 6 (0x6), region = 78 }
 0x2dd   :  { %515 = vsyncpa [#allocation3], 1 }
 0x2de   :  { %517 = vsyncpa [#allocation3 + $0x1], 1 }
 0x2df   :  { %518 = vsyncpa [#allocation6], 1 }
 0x2e0   :  { %520 = vsyncpa [#allocation6 + $0x1], 1 }
 0x2e1   :  { %521 = vsyncpa [#allocation4], 1 }
 0x2e2   :  { %523 = vsyncpa [#allocation4 + $0x1], 1 }

</bundles_post_ra>
